<compile_context>
chip_gen: v6e
topology: v6e:2x2x1
jax: 0.10.0
libtpu: 0.0.40
codegen_flags: <defaults>
</compile_context>

<pallas_src>
import math
from functools import partial

import jax
import jax.numpy as jnp
from jax.experimental import pallas as pl
from jax.experimental.pallas import tpu as pltpu


def _spatio_conv_kernel(x_ref, lk_ref, th_ref, b_ref, o_ref, *,
                        tb, s, ks, mm_dtype):
    # x_ref : VMEM (TB, CG, S, n)  rows q = i*G + j of group r <-> (i, t=r+j*S)
    # lk_ref: VMEM (ks, n, n)      lk[k, m, n'] = Lk[k, n', m]
    # th_ref: VMEM (ks, CG, CG)    kron(theta[:, :, k].T, I_G)
    # b_ref : VMEM (CG, 1)         bias per output channel, repeated G times
    # o_ref : VMEM (TB, CG, S, n)
    cg = x_ref.shape[1]
    n = x_ref.shape[3]

    # Hoisted once: JAX does not CSE broadcast_in_dim inside unrolled loops.
    bias_full = jnp.broadcast_to(b_ref[...], (cg, n))

    for ib in range(tb):                 # small static batch tile
        for r in range(s):               # time groups (congruence classes)
            xg = x_ref[ib, :, r, :]                          # (CG, n), f32
            xg_mm = xg.astype(mm_dtype)
            acc = jnp.zeros((cg, n), jnp.float32)
            for k in range(ks):          # Chebyshev terms
                # Graph conv: (CG, n) @ (n, n) on the MXU, f32 accumulation.
                xc = jnp.dot(xg_mm, lk_ref[k],
                             preferred_element_type=jnp.float32)
                # Channel mix over i for all times in the group at once:
                # (CG, CG) @ (CG, n); contraction depth CG ~ 256 fills the MXU.
                acc = acc + jnp.dot(th_ref[k], xc.astype(mm_dtype),
                                    preferred_element_type=jnp.float32)
            out = jnp.maximum(acc + bias_full + xg, 0.0)     # bias+res+ReLU
            o_ref[ib, :, r, :] = out.astype(o_ref.dtype)


def _round_up(v, m):
    return (v + m - 1) // m * m


def _device_kind():
    try:
        return jax.devices()[0].device_kind.lower()
    except Exception:
        return ""


def _vmem_limit_bytes(kind):
    """Generation-aware scoped-VMEM limit (None -> keep compiler default)."""
    if "v7" in kind:
        return 44 * 1024 * 1024          # v7x: 64 MiB physical VMEM per core
    if ("v6" in kind) or ("v5e" in kind) or ("v5 lite" in kind) \
            or ("v5litepod" in kind):
        return 90 * 1024 * 1024          # v5e / v6e: 128 MiB physical VMEM
    return None


def _pick_group(c, t):
    """Largest divisor G of T with c*G <= 256 (MXU-filling contraction)."""
    g = 1
    for cand in range(1, t + 1):
        if t % cand == 0 and c * cand <= 256:
            g = cand
    return g


def _pick_batch_tile(b, ct, per_batch_bytes, avail_bytes, prefer_even_steps):
    """Largest divisor of b within the VMEM budget; TB only amortizes the
    ~0.35us per-grid-step overhead (matmul M dim is independent of TB)."""
    cap = max(1, avail_bytes // max(1, per_batch_bytes))
    cap = min(cap, 8, max(1, 2048 // max(1, ct)), b)
    divisors = [d for d in range(1, cap + 1) if b % d == 0]
    if prefer_even_steps:                # v7x: keep both TensorCores busy
        even = [d for d in divisors if (b // d) % 2 == 0]
        if even:
            return max(even)
    return max(divisors) if divisors else 1


def spatio_conv_forward(x, Lk, theta, bias, *, matmul_dtype=jnp.bfloat16):
    """x: (b, c, T, n), Lk: (ks, n, n), theta: (c, c, ks), bias: (1, c, 1, 1)."""
    b, c, T, n = x.shape
    ks = Lk.shape[0]
    ct = c * T

    G = _pick_group(c, T)
    S = T // G
    CG = c * G

    # Free metadata reshape: flat row i*T + t == q*S + r with q = i*G + j and
    # t = r + j*S, so group r is a plain slice along axis 2.  No pad, no
    # transpose, no post-call slice (all were extra HBM passes before).
    x4 = x.reshape(b, CG, S, n)

    # Graph kernels with the node contraction as a plain matmul:
    #   lk_t[k, m, n'] = Lk[k, n', m].  Per-k 3-D layout -> no lane slicing of
    # wide matmul outputs, so unpadded n stays lane-clean (last dim = full dim).
    lk_t = jnp.transpose(Lk, (0, 2, 1)).astype(matmul_dtype)

    # Channel/Chebyshev mix weights, block-diagonal only over the within-group
    # time index: ks*(c*G)^2 elements instead of ks*(c*T)^2.
    eye_g = jnp.eye(G, dtype=jnp.float32)
    kth = jnp.stack([jnp.kron(theta[:, :, k].T.astype(jnp.float32), eye_g)
                     for k in range(ks)]).astype(matmul_dtype)   # (ks, CG, CG)

    # Bias per output channel o, repeated over the within-group index j.
    bias_col = jnp.repeat(bias.reshape(c), G).reshape(CG, 1).astype(jnp.float32)

    # ---- VMEM accounting (resident operands charged, double-buffer once) ----
    kind = _device_kind()
    vmem_cap = _vmem_limit_bytes(kind)
    budget = vmem_cap if vmem_cap is not None else 28 * 1024 * 1024
    mm_item = jnp.dtype(matmul_dtype).itemsize

    def _tile_bytes(lead, sub, lane, item):
        return lead * _round_up(sub, 8) * _round_up(lane, 128) * item

    resident = 2 * (_tile_bytes(ks, n, n, mm_item)        # lk_t (x2 buffers)
                    + _tile_bytes(ks, CG, CG, mm_item)    # kth
                    + _tile_bytes(1, CG, 1, 4))           # bias
    transient = 6 * CG * _round_up(n, 128) * 4            # xc/acc/xg/bias bcast
    # x block + out block for one batch element, double-buffered (counted once).
    per_batch = 2 * 2 * CG * _round_up(S, 8) * _round_up(n, 128) * 4
    avail = max(0, budget - resident - transient)
    tb = _pick_batch_tile(b, ct, per_batch, avail,
                          prefer_even_steps=("v7" in kind))
    grid = (b // tb,)

    cost = pl.CostEstimate(
        flops=2 * b * S * ks * (CG * n * n + CG * CG * n) + 3 * b * ct * n,
        transcendentals=0,
        bytes_accessed=4 * 2 * b * ct * n
        + mm_item * (ks * n * n + ks * CG * CG) + 4 * CG,
    )

    kernel = partial(_spatio_conv_kernel, tb=tb, s=S, ks=ks,
                     mm_dtype=matmul_dtype)

    out4 = pl.pallas_call(
        kernel,
        out_shape=jax.ShapeDtypeStruct((b, CG, S, n), x.dtype),
        grid_spec=pltpu.PrefetchScalarGridSpec(
            num_scalar_prefetch=0,
            grid=grid,
            in_specs=[
                pl.BlockSpec((tb, CG, S, n), lambda i: (i, 0, 0, 0)),
                pl.BlockSpec((ks, n, n), lambda i: (0, 0, 0)),
                pl.BlockSpec((ks, CG, CG), lambda i: (0, 0, 0)),
                pl.BlockSpec((CG, 1), lambda i: (0, 0)),
            ],
            out_specs=pl.BlockSpec((tb, CG, S, n), lambda i: (i, 0, 0, 0)),
        ),
        compiler_params=pltpu.CompilerParams(
            dimension_semantics=("parallel",),
            vmem_limit_bytes=vmem_cap),
        cost_estimate=cost,
    )(x4, lk_t, kth, bias_col)

    return out4.reshape(b, c, T, n)       # free metadata reshape back


def init_params(key, c, ks):
    # Mirrors nn.init.kaiming_uniform_(theta, a=sqrt(5)) + uniform bias bound,
    # but with JAX PRNG for determinism (synthetic weights, no checkpoint).
    k_theta, k_bias = jax.random.split(key)
    fan_in = c * ks                       # torch fan_in of a (c, c, ks) tensor
    bound = 1.0 / math.sqrt(fan_in)
    theta = jax.random.uniform(k_theta, (c, c, ks), jnp.float32, -bound, bound)
    bias = jax.random.uniform(k_bias, (1, c, 1, 1), jnp.float32, -bound, bound)
    return theta, bias


def reference_forward(x, Lk, theta, bias):
    hp = jax.lax.Precision.HIGHEST
    x_c = jnp.einsum('knm,bitm->bitkn', Lk, x, precision=hp)
    x_gc = jnp.einsum('iok,bitkn->botn', theta, x_c, precision=hp) + bias
    return jax.nn.relu(x_gc + x)


if __name__ == "__main__":
    key = jax.random.PRNGKey(0)

    def _make_case(case_key, b, c, T, n, ks):
        k_x, k_lk, k_p = jax.random.split(case_key, 3)
        x = jax.random.normal(k_x, (b, c, T, n), jnp.float32)
        Lk = jax.random.normal(k_lk, (ks, n, n), jnp.float32) / math.sqrt(n)
        theta, bias = init_params(k_p, c, ks)
        return x, Lk, theta, bias

    k1, k2 = jax.random.split(key)

    # Case 1: small module-default shapes (c*T <= 256 -> single time group).
    x, Lk, theta, bias = _make_case(k1, 2, 4, 8, 16, 3)
    ref = reference_forward(x, Lk, theta, bias)

    out_f32 = jax.block_until_ready(
        spatio_conv_forward(x, Lk, theta, bias, matmul_dtype=jnp.float32))
    assert out_f32.shape == ref.shape and out_f32.dtype == ref.dtype
    assert jnp.allclose(out_f32, ref, atol=1e-4, rtol=1e-4), "f32 mismatch"

    out_bf16 = jax.block_until_ready(
        spatio_conv_forward(x, Lk, theta, bias))          # default bf16 matmuls
    assert jnp.allclose(out_bf16, ref, atol=5e-2, rtol=5e-2), "bf16 mismatch"

    # Case 2: exercises the grouped channel-mix path (c*T > 256 -> S > 1).
    x2, Lk2, theta2, bias2 = _make_case(k2, 2, 64, 8, 48, 3)
    ref2 = reference_forward(x2, Lk2, theta2, bias2)
    out2 = jax.block_until_ready(
        spatio_conv_forward(x2, Lk2, theta2, bias2, matmul_dtype=jnp.float32))
    assert jnp.allclose(out2, ref2, atol=2e-3, rtol=2e-3), "grouped mismatch"

    print("KERNEL_OK")
</pallas_src>

<mosaic_0001>
module attributes {stable_mosaic.version = 11 : i64} {
  func.func @_spatio_conv_kernel(%arg0: i32, %arg1: memref<2x32x1x16xf32, #tpu.memory_space<vmem>>, %arg2: memref<3x16x16xf32, #tpu.memory_space<vmem>>, %arg3: memref<3x32x32xf32, #tpu.memory_space<vmem>>, %arg4: memref<32x1xf32, #tpu.memory_space<vmem>>, %arg5: memref<2x32x1x16xf32, #tpu.memory_space<vmem>>) attributes {dimension_semantics = [#tpu.dimension_semantics<parallel>], iteration_bounds = array<i64: 1>, scalar_prefetch = 0 : i64, scratch_operands = 0 : i64, tpu.core_type = #tpu.core_type<tc>, window_params = [{transform_indices = @transform_0, window_bounds = array<i64: 2, 32, 1, 16>}, {pipeline_mode = #tpu.pipeline_mode<synchronous>, transform_indices = @transform_1, window_bounds = array<i64: 3, 16, 16>}, {pipeline_mode = #tpu.pipeline_mode<synchronous>, transform_indices = @transform_2, window_bounds = array<i64: 3, 32, 32>}, {pipeline_mode = #tpu.pipeline_mode<synchronous>, transform_indices = @transform_3, window_bounds = array<i64: 32, 1>}, {transform_indices = @transform_4, window_bounds = array<i64: 2, 32, 1, 16>}]} {
    %c0 = arith.constant 0 : index
    %c0_0 = arith.constant 0 : index
    %0 = vector.load %arg4[%c0, %c0_0] : memref<32x1xf32, #tpu.memory_space<vmem>>, vector<32x1xf32>
    %1 = vector.shape_cast %0 : vector<32x1xf32> to vector<32x1xf32>
    %2 = vector.broadcast %1 : vector<32x1xf32> to vector<32x16xf32>
    %c0_1 = arith.constant 0 : index
    %c0_2 = arith.constant 0 : index
    %c0_3 = arith.constant 0 : index
    %c0_4 = arith.constant 0 : index
    %3 = vector.load %arg1[%c0_1, %c0_2, %c0_3, %c0_4] : memref<2x32x1x16xf32, #tpu.memory_space<vmem>>, vector<1x32x1x16xf32>
    %4 = vector.shape_cast %3 : vector<1x32x1x16xf32> to vector<32x16xf32>
    %cst = arith.constant 0.000000e+00 : f32
    %5 = vector.broadcast %cst : f32 to vector<32x16xf32>
    %c0_5 = arith.constant 0 : index
    %c0_6 = arith.constant 0 : index
    %c0_7 = arith.constant 0 : index
    %6 = vector.load %arg2[%c0_5, %c0_6, %c0_7] : memref<3x16x16xf32, #tpu.memory_space<vmem>>, vector<1x16x16xf32>
    %7 = vector.shape_cast %6 : vector<1x16x16xf32> to vector<16x16xf32>
    %cst_8 = arith.constant dense<0.000000e+00> : vector<32x16xf32>
    %8 = tpu.matmul %4, %7, %cst_8 {dimension_numbers = #tpu.dot_dimension_numbers<[1], [0], [0], [1], [0, 0, 1, 1], [], []>} : vector<32x16xf32>, vector<16x16xf32>, vector<32x16xf32> -> vector<32x16xf32>
    %c0_9 = arith.constant 0 : index
    %c0_10 = arith.constant 0 : index
    %c0_11 = arith.constant 0 : index
    %9 = vector.load %arg3[%c0_9, %c0_10, %c0_11] : memref<3x32x32xf32, #tpu.memory_space<vmem>>, vector<1x32x32xf32>
    %10 = vector.shape_cast %9 : vector<1x32x32xf32> to vector<32x32xf32>
    %cst_12 = arith.constant dense<0.000000e+00> : vector<32x16xf32>
    %11 = tpu.matmul %10, %8, %cst_12 {dimension_numbers = #tpu.dot_dimension_numbers<[1], [0], [0], [1], [0, 0, 1, 1], [], []>} : vector<32x32xf32>, vector<32x16xf32>, vector<32x16xf32> -> vector<32x16xf32>
    %12 = arith.addf %5, %11 : vector<32x16xf32>
    %c1 = arith.constant 1 : index
    %c0_13 = arith.constant 0 : index
    %c0_14 = arith.constant 0 : index
    %13 = vector.load %arg2[%c1, %c0_13, %c0_14] : memref<3x16x16xf32, #tpu.memory_space<vmem>>, vector<1x16x16xf32>
    %14 = vector.shape_cast %13 : vector<1x16x16xf32> to vector<16x16xf32>
    %cst_15 = arith.constant dense<0.000000e+00> : vector<32x16xf32>
    %15 = tpu.matmul %4, %14, %cst_15 {dimension_numbers = #tpu.dot_dimension_numbers<[1], [0], [0], [1], [0, 0, 1, 1], [], []>} : vector<32x16xf32>, vector<16x16xf32>, vector<32x16xf32> -> vector<32x16xf32>
    %c1_16 = arith.constant 1 : index
    %c0_17 = arith.constant 0 : index
    %c0_18 = arith.constant 0 : index
    %16 = vector.load %arg3[%c1_16, %c0_17, %c0_18] : memref<3x32x32xf32, #tpu.memory_space<vmem>>, vector<1x32x32xf32>
    %17 = vector.shape_cast %16 : vector<1x32x32xf32> to vector<32x32xf32>
    %cst_19 = arith.constant dense<0.000000e+00> : vector<32x16xf32>
    %18 = tpu.matmul %17, %15, %cst_19 {dimension_numbers = #tpu.dot_dimension_numbers<[1], [0], [0], [1], [0, 0, 1, 1], [], []>} : vector<32x32xf32>, vector<32x16xf32>, vector<32x16xf32> -> vector<32x16xf32>
    %19 = arith.addf %12, %18 : vector<32x16xf32>
    %c2 = arith.constant 2 : index
    %c0_20 = arith.constant 0 : index
    %c0_21 = arith.constant 0 : index
    %20 = vector.load %arg2[%c2, %c0_20, %c0_21] : memref<3x16x16xf32, #tpu.memory_space<vmem>>, vector<1x16x16xf32>
    %21 = vector.shape_cast %20 : vector<1x16x16xf32> to vector<16x16xf32>
    %cst_22 = arith.constant dense<0.000000e+00> : vector<32x16xf32>
    %22 = tpu.matmul %4, %21, %cst_22 {dimension_numbers = #tpu.dot_dimension_numbers<[1], [0], [0], [1], [0, 0, 1, 1], [], []>} : vector<32x16xf32>, vector<16x16xf32>, vector<32x16xf32> -> vector<32x16xf32>
    %c2_23 = arith.constant 2 : index
    %c0_24 = arith.constant 0 : index
    %c0_25 = arith.constant 0 : index
    %23 = vector.load %arg3[%c2_23, %c0_24, %c0_25] : memref<3x32x32xf32, #tpu.memory_space<vmem>>, vector<1x32x32xf32>
    %24 = vector.shape_cast %23 : vector<1x32x32xf32> to vector<32x32xf32>
    %cst_26 = arith.constant dense<0.000000e+00> : vector<32x16xf32>
    %25 = tpu.matmul %24, %22, %cst_26 {dimension_numbers = #tpu.dot_dimension_numbers<[1], [0], [0], [1], [0, 0, 1, 1], [], []>} : vector<32x32xf32>, vector<32x16xf32>, vector<32x16xf32> -> vector<32x16xf32>
    %26 = arith.addf %19, %25 : vector<32x16xf32>
    %27 = arith.addf %26, %2 : vector<32x16xf32>
    %28 = arith.addf %27, %4 : vector<32x16xf32>
    %cst_27 = arith.constant 0.000000e+00 : f32
    %29 = vector.broadcast %cst_27 : f32 to vector<32x16xf32>
    %30 = arith.maximumf %28, %29 : vector<32x16xf32>
    %c0_28 = arith.constant 0 : index
    %c0_29 = arith.constant 0 : index
    %c0_30 = arith.constant 0 : index
    %c0_31 = arith.constant 0 : index
    %31 = vector.load %arg5[%c0_28, %c0_29, %c0_30, %c0_31] : memref<2x32x1x16xf32, #tpu.memory_space<vmem>>, vector<1x32x1x16xf32>
    %32 = vector.shape_cast %31 : vector<1x32x1x16xf32> to vector<32x16xf32>
    %33 = vector.shape_cast %30 : vector<32x16xf32> to vector<1x32x1x16xf32>
    tpu.vector_store %arg5[%c0_28, %c0_29, %c0_30, %c0_31], %33 {strides = array<i32>} : memref<2x32x1x16xf32, #tpu.memory_space<vmem>>, vector<1x32x1x16xf32>,
    %c1_32 = arith.constant 1 : index
    %c0_33 = arith.constant 0 : index
    %c0_34 = arith.constant 0 : index
    %c0_35 = arith.constant 0 : index
    %34 = vector.load %arg1[%c1_32, %c0_33, %c0_34, %c0_35] : memref<2x32x1x16xf32, #tpu.memory_space<vmem>>, vector<1x32x1x16xf32>
    %35 = vector.shape_cast %34 : vector<1x32x1x16xf32> to vector<32x16xf32>
    %cst_36 = arith.constant 0.000000e+00 : f32
    %36 = vector.broadcast %cst_36 : f32 to vector<32x16xf32>
    %c0_37 = arith.constant 0 : index
    %c0_38 = arith.constant 0 : index
    %c0_39 = arith.constant 0 : index
    %37 = vector.load %arg2[%c0_37, %c0_38, %c0_39] : memref<3x16x16xf32, #tpu.memory_space<vmem>>, vector<1x16x16xf32>
    %38 = vector.shape_cast %37 : vector<1x16x16xf32> to vector<16x16xf32>
    %cst_40 = arith.constant dense<0.000000e+00> : vector<32x16xf32>
    %39 = tpu.matmul %35, %38, %cst_40 {dimension_numbers = #tpu.dot_dimension_numbers<[1], [0], [0], [1], [0, 0, 1, 1], [], []>} : vector<32x16xf32>, vector<16x16xf32>, vector<32x16xf32> -> vector<32x16xf32>
    %c0_41 = arith.constant 0 : index
    %c0_42 = arith.constant 0 : index
    %c0_43 = arith.constant 0 : index
    %40 = vector.load %arg3[%c0_41, %c0_42, %c0_43] : memref<3x32x32xf32, #tpu.memory_space<vmem>>, vector<1x32x32xf32>
    %41 = vector.shape_cast %40 : vector<1x32x32xf32> to vector<32x32xf32>
    %cst_44 = arith.constant dense<0.000000e+00> : vector<32x16xf32>
    %42 = tpu.matmul %41, %39, %cst_44 {dimension_numbers = #tpu.dot_dimension_numbers<[1], [0], [0], [1], [0, 0, 1, 1], [], []>} : vector<32x32xf32>, vector<32x16xf32>, vector<32x16xf32> -> vector<32x16xf32>
    %43 = arith.addf %36, %42 : vector<32x16xf32>
    %c1_45 = arith.constant 1 : index
    %c0_46 = arith.constant 0 : index
    %c0_47 = arith.constant 0 : index
    %44 = vector.load %arg2[%c1_45, %c0_46, %c0_47] : memref<3x16x16xf32, #tpu.memory_space<vmem>>, vector<1x16x16xf32>
    %45 = vector.shape_cast %44 : vector<1x16x16xf32> to vector<16x16xf32>
    %cst_48 = arith.constant dense<0.000000e+00> : vector<32x16xf32>
    %46 = tpu.matmul %35, %45, %cst_48 {dimension_numbers = #tpu.dot_dimension_numbers<[1], [0], [0], [1], [0, 0, 1, 1], [], []>} : vector<32x16xf32>, vector<16x16xf32>, vector<32x16xf32> -> vector<32x16xf32>
    %c1_49 = arith.constant 1 : index
    %c0_50 = arith.constant 0 : index
    %c0_51 = arith.constant 0 : index
    %47 = vector.load %arg3[%c1_49, %c0_50, %c0_51] : memref<3x32x32xf32, #tpu.memory_space<vmem>>, vector<1x32x32xf32>
    %48 = vector.shape_cast %47 : vector<1x32x32xf32> to vector<32x32xf32>
    %cst_52 = arith.constant dense<0.000000e+00> : vector<32x16xf32>
    %49 = tpu.matmul %48, %46, %cst_52 {dimension_numbers = #tpu.dot_dimension_numbers<[1], [0], [0], [1], [0, 0, 1, 1], [], []>} : vector<32x32xf32>, vector<32x16xf32>, vector<32x16xf32> -> vector<32x16xf32>
    %50 = arith.addf %43, %49 : vector<32x16xf32>
    %c2_53 = arith.constant 2 : index
    %c0_54 = arith.constant 0 : index
    %c0_55 = arith.constant 0 : index
    %51 = vector.load %arg2[%c2_53, %c0_54, %c0_55] : memref<3x16x16xf32, #tpu.memory_space<vmem>>, vector<1x16x16xf32>
    %52 = vector.shape_cast %51 : vector<1x16x16xf32> to vector<16x16xf32>
    %cst_56 = arith.constant dense<0.000000e+00> : vector<32x16xf32>
    %53 = tpu.matmul %35, %52, %cst_56 {dimension_numbers = #tpu.dot_dimension_numbers<[1], [0], [0], [1], [0, 0, 1, 1], [], []>} : vector<32x16xf32>, vector<16x16xf32>, vector<32x16xf32> -> vector<32x16xf32>
    %c2_57 = arith.constant 2 : index
    %c0_58 = arith.constant 0 : index
    %c0_59 = arith.constant 0 : index
    %54 = vector.load %arg3[%c2_57, %c0_58, %c0_59] : memref<3x32x32xf32, #tpu.memory_space<vmem>>, vector<1x32x32xf32>
    %55 = vector.shape_cast %54 : vector<1x32x32xf32> to vector<32x32xf32>
    %cst_60 = arith.constant dense<0.000000e+00> : vector<32x16xf32>
    %56 = tpu.matmul %55, %53, %cst_60 {dimension_numbers = #tpu.dot_dimension_numbers<[1], [0], [0], [1], [0, 0, 1, 1], [], []>} : vector<32x32xf32>, vector<32x16xf32>, vector<32x16xf32> -> vector<32x16xf32>
    %57 = arith.addf %50, %56 : vector<32x16xf32>
    %58 = arith.addf %57, %2 : vector<32x16xf32>
    %59 = arith.addf %58, %35 : vector<32x16xf32>
    %cst_61 = arith.constant 0.000000e+00 : f32
    %60 = vector.broadcast %cst_61 : f32 to vector<32x16xf32>
    %61 = arith.maximumf %59, %60 : vector<32x16xf32>
    %c1_62 = arith.constant 1 : index
    %c0_63 = arith.constant 0 : index
    %c0_64 = arith.constant 0 : index
    %c0_65 = arith.constant 0 : index
    %62 = vector.load %arg5[%c1_62, %c0_63, %c0_64, %c0_65] : memref<2x32x1x16xf32, #tpu.memory_space<vmem>>, vector<1x32x1x16xf32>
    %63 = vector.shape_cast %62 : vector<1x32x1x16xf32> to vector<32x16xf32>
    %64 = vector.shape_cast %61 : vector<32x16xf32> to vector<1x32x1x16xf32>
    tpu.vector_store %arg5[%c1_62, %c0_63, %c0_64, %c0_65], %64 {strides = array<i32>} : memref<2x32x1x16xf32, #tpu.memory_space<vmem>>, vector<1x32x1x16xf32>,
    return
  }
  func.func @transform_0(%arg0: i32) -> (i32, i32, i32, i32) {
    %c0_i32 = arith.constant 0 : i32
    %c0_i32_0 = arith.constant 0 : i32
    %c0_i32_1 = arith.constant 0 : i32
    %c0_i32_2 = arith.constant 0 : i32
    return %arg0, %c0_i32, %c0_i32_0, %c0_i32_1 : i32, i32, i32, i32
  }
  func.func @transform_1(%arg0: i32) -> (i32, i32, i32) {
    %c0_i32 = arith.constant 0 : i32
    %c0_i32_0 = arith.constant 0 : i32
    %c0_i32_1 = arith.constant 0 : i32
    %c0_i32_2 = arith.constant 0 : i32
    return %c0_i32, %c0_i32_0, %c0_i32_1 : i32, i32, i32
  }
  func.func @transform_2(%arg0: i32) -> (i32, i32, i32) {
    %c0_i32 = arith.constant 0 : i32
    %c0_i32_0 = arith.constant 0 : i32
    %c0_i32_1 = arith.constant 0 : i32
    %c0_i32_2 = arith.constant 0 : i32
    return %c0_i32, %c0_i32_0, %c0_i32_1 : i32, i32, i32
  }
  func.func @transform_3(%arg0: i32) -> (i32, i32) {
    %c0_i32 = arith.constant 0 : i32
    %c0_i32_0 = arith.constant 0 : i32
    %c0_i32_1 = arith.constant 0 : i32
    return %c0_i32, %c0_i32_0 : i32, i32
  }
  func.func @transform_4(%arg0: i32) -> (i32, i32, i32, i32) {
    %c0_i32 = arith.constant 0 : i32
    %c0_i32_0 = arith.constant 0 : i32
    %c0_i32_1 = arith.constant 0 : i32
    %c0_i32_2 = arith.constant 0 : i32
    return %arg0, %c0_i32, %c0_i32_0, %c0_i32_1 : i32, i32, i32, i32
  }
}

</mosaic_0001>

<bundles_post_ra>
// kernel: tpu_custom_call.1
= control target key start
LH: loop header
LB: loop body
LE: loop exit
PB: predicated region body
PF: predicated region fallthrough
CT: control target
= control target key end

     0   :  { %9 = vsyncpa [#allocation3], 0  ;;  %s2686_s15 = smov [#allocation2]   ;;  %s3513_s0 = inlined_call_operand.vmem [shape: f32[2,32,1,16], index: 0, kind: input, shape index: {}]   ;;  %s3514_s1 = inlined_call_operand.hbm [shape: f32[3,16,16], index: 1, kind: input, shape index: {}]   ;;  %s3515_s2 = inlined_call_operand.vmem [shape: f32[3,32,32], index: 2, kind: input, shape index: {}]   ;;  %s3516_s3 = inlined_call_operand.vmem [shape: f32[32,1], index: 3, kind: input, shape index: {}]   ;;  %s3517_s4 = inlined_call_operand.vmem [shape: f32[2,32,1,16], index: 4, kind: output, shape index: {}]  }
   0x1   :  { %s17_s16 = sshll.u32 %s2686_s15, 4  ;;  %s18_s16 = int_to_ptr.vmem [resolvable:$true] %s17_s16 }
   0x2   :  { %s2672_s17 = scalar_lea.vmem %s18_s16, 768  ;;  %p2677_p1 = scmp.lt.s32.totalorder %s18_s16, %s18_s16 }
   0x3   :  { %p2673_p0 = scmp.ne.s32.totalorder %s18_s16, %s2672_s17  ;;  %p2678_p2 = scmp.lt.s32.totalorder %s2672_s17, %s2672_s17 }
   0x5   :  { %p2679_p3 = por %p2678_p2, %p2677_p1 }
   0x7   :  { %p2680_p4 = pnand %p2679_p3, %p2673_p0 }
   0x9   :  { %2683 = shalt.err (!%p2680_p4)
}
   0xa   :  { %s2687_s18 = smov 128   ;;  %s2688_s19 = smov 8  }
   0xb   :  { %23 = dma.hbm_to_vmem [thread:$0]  %s3514_s1, 768, %s18_s16, [#allocation3], %s2687_s18, %s2687_s18, %s2688_s19  }
   0xc   :  { %2684 = dma.done.wait [#allocation3], 768  }
   0xd   :  { %2685 = vsyncadd [#allocation3], 4294966528  ;;  %v128_v0 = vlaneseq  ;;  %v2689_v1 = vmov 1966171168   ;;  %v2719_v5 = vld [vmem:[#allocation2 + $0x8] sm:$0xff]  ;;  %v2721_v6 = vld [vmem:[#allocation2 + $0x18] sm:$0xff] }
   0xe   :  { %v126_v2 = vunpack.c.l.s4 %v2689_v1  ;;  %v2723_v7 = vld [vmem:[#allocation2] sm:$0xff]  ;;  %2513 = vmatprep.subr.mxu0 %v2719_v5  ;;  %2523 = vmatprep.subr.mxu1 %v2721_v6  ;;  %v2729_v9 = vld [vmem:[#allocation2 + $0x10] sm:$0xff]  ;;  %vm317_vm0 = vcmask 130048   ;;  %v63_v23 = vld [vmem:[%s3513_s0 + $0x8] sm:$0x1]  ;;  %vm508_vm1 = vcmask 261120  }
   0xf   :  { %v129_v4 = vshrl.u32 %v128_v0, 7  ;;  %v55_v10 = vld [vmem:[%s3513_s0] sm:$0x1]  ;;  %v56_v11 = vld [vmem:[%s3513_s0 + $0x1] sm:$0x1]  ;;  %2514 = vmatpush3.msra.mxu0 %v2719_v5  ;;  %2524 = vmatpush3.msra.mxu1 %v2721_v6  ;;  %vm1145_vm2 = vcmask 122880  }
  0x10   :  { %v127_v3 = vunpack.c.0.s8 %v126_v2  ;;  %v57_v12 = vld [vmem:[%s3513_s0 + $0x2] sm:$0x1]  ;;  %v58_v13 = vld [vmem:[%s3513_s0 + $0x3] sm:$0x1]  ;;  %v59_v14 = vld [vmem:[%s3513_s0 + $0x4] sm:$0x1]  ;;  %v121_v15 = vcombine.low %v55_v10, %v56_v11  ;;  %2515 = vmatprep.subr.mxu0 %v2723_v7  ;;  %2525 = vmatprep.subr.mxu1 %v2729_v9 }
  0x11   :  { %v60_v16 = vld [vmem:[%s3513_s0 + $0x5] sm:$0x1]  ;;  %v61_v17 = vld [vmem:[%s3513_s0 + $0x6] sm:$0x1]  ;;  %v62_v18 = vld [vmem:[%s3513_s0 + $0x7] sm:$0x1]  ;;  %v122_v19 = vcombine.low %v57_v12, %v58_v13  ;;  %2516 = vmatpush3.msra.mxu0 %v2723_v7  ;;  %2526 = vmatpush3.msra.mxu1 %v2729_v9 }
  0x12   :  { %v2725_v8 = vsub.s32 %v127_v3, %v129_v4  ;;  %v123_v20 = vcombine.low %v59_v14, %v60_v16  ;;  %v124_v21 = vcombine.low %v61_v17, %v62_v18  ;;  %v64_v24 = vld [vmem:[%s3513_s0 + $0x9] sm:$0x1]  ;;  %v65_v25 = vld [vmem:[%s3513_s0 + $0xa] sm:$0x1]  ;;  %v66_v27 = vld [vmem:[%s3513_s0 + $0xb] sm:$0x1] }
  0x13   :  { %v67_v28 = vld [vmem:[%s3513_s0 + $0xc] sm:$0x1]  ;;  %v68_v29 = vld [vmem:[%s3513_s0 + $0xd] sm:$0x1]  ;;  %v170_v30 = vcombine.low %v63_v23, %v64_v24  ;;  %v69_v33 = vld [vmem:[%s3513_s0 + $0xe] sm:$0x1]  ;;  %v171_v35 = vcombine.low %v65_v25, %v66_v27 }
  0x14   :  { %v131_v22 = vrot.slane %v121_v15, %v2725_v8  ;;  %v138_v26 = vrot.slane %v122_v19, %v2725_v8  ;;  %v145_v31 = vrot.slane %v123_v20, %v2725_v8  ;;  %v152_v32 = vrot.slane %v124_v21, %v2725_v8  ;;  %v70_v34 = vld [vmem:[%s3513_s0 + $0xf] sm:$0x1]  ;;  %v71_v37 = vld [vmem:[%s3513_s0 + $0x10] sm:$0x1]  ;;  %v72_v41 = vld [vmem:[%s3513_s0 + $0x11] sm:$0x1] }
  0x15   :  { %v172_v36 = vcombine.low %v67_v28, %v68_v29  ;;  %v173_v39 = vcombine.low %v69_v33, %v70_v34  ;;  %v180_v40 = vrot.slane %v170_v30, %v2725_v8  ;;  %v73_v42 = vld [vmem:[%s3513_s0 + $0x12] sm:$0x1]  ;;  %v74_v43 = vld [vmem:[%s3513_s0 + $0x13] sm:$0x1]  ;;  %v187_v45 = vrot.slane %v171_v35, %v2725_v8  ;;  %v75_v47 = vld [vmem:[%s3513_s0 + $0x14] sm:$0x1] }
  0x16   :  { %v153_v38 = vcombine.low %v131_v22, %v138_v26  ;;  %v154_v44 = vcombine.low %v145_v31, %v152_v32  ;;  %v76_v48 = vld [vmem:[%s3513_s0 + $0x15] sm:$0x1]  ;;  %v77_v49 = vld [vmem:[%s3513_s0 + $0x16] sm:$0x1]  ;;  %v219_v50 = vcombine.low %v71_v37, %v72_v41  ;;  %v78_v53 = vld [vmem:[%s3513_s0 + $0x17] sm:$0x1]  ;;  %v220_v54 = vcombine.low %v73_v42, %v74_v43 }
  0x17   :  { %v194_v46 = vrot.slane %v172_v36, %v2725_v8  ;;  %v201_v52 = vrot.slane %v173_v39, %v2725_v8  ;;  %v221_v55 = vcombine.low %v75_v47, %v76_v48  ;;  %v79_v56 = vld [vmem:[%s3513_s0 + $0x18] sm:$0x1]  ;;  %v80_v57 = vld [vmem:[%s3513_s0 + $0x19] sm:$0x1]  ;;  %v202_v59 = vcombine.low %v180_v40, %v187_v45  ;;  %v81_v62 = vld [vmem:[%s3513_s0 + $0x1a] sm:$0x1] }
  0x18   :  { %v161_v51 = vrot.slane %v153_v38, %v2725_v8  ;;  %v168_v58 = vrot.slane %v154_v44, %v2725_v8  ;;  %v222_v60 = vcombine.low %v77_v49, %v78_v53  ;;  %v229_v61 = vrot.slane %v219_v50, %v2725_v8  ;;  %v82_v63 = vld [vmem:[%s3513_s0 + $0x1b] sm:$0x1]  ;;  %v83_v0 = vld [vmem:[%s3513_s0 + $0x1c] sm:$0x1]  ;;  %v84_v4 = vld [vmem:[%s3513_s0 + $0x1d] sm:$0x1] }
  0x19   :  { %v203_v1 = vcombine.low %v194_v46, %v201_v52  ;;  %v236_v2 = vrot.slane %v220_v54, %v2725_v8  ;;  %v243_v3 = vrot.slane %v221_v55, %v2725_v8  ;;  %v85_v10 = vld [vmem:[%s3513_s0 + $0x1e] sm:$0x1]  ;;  %v86_v11 = vld [vmem:[%s3513_s0 + $0x1f] sm:$0x1]  ;;  %v268_v12 = vcombine.low %v79_v56, %v80_v57  ;;  %v2884_v35 = vld [vmem:[%s3515_s2 + $0x20] sm:$0xff] }
  0x1a   :  { %v2846_v13 = vcombine.low %v161_v51, %v168_v58  ;;  %v210_v14 = vrot.slane %v202_v59, %v2725_v8  ;;  %v250_v15 = vrot.slane %v222_v60, %v2725_v8  ;;  %v269_v16 = vcombine.low %v81_v62, %v82_v63  ;;  %v2889_v36 = vld [vmem:[%s3515_s2] sm:$0xff]  ;;  %v2898_v45 = vld [vmem:[%s3515_s2 + $0x28] sm:$0xff]  ;;  %v2910_v48 = vld [vmem:[%s3515_s2 + $0x30] sm:$0xff] }
  0x1b   :  { %v217_v17 = vrot.slane %v203_v1, %v2725_v8  ;;  %v251_v18 = vcombine.low %v229_v61, %v236_v2  ;;  %v270_v19 = vcombine.low %v83_v0, %v84_v4  ;;  %v271_v20 = vcombine.low %v85_v10, %v86_v11  ;;  %v2903_v46 = vld [vmem:[%s3515_s2 + $0x8] sm:$0xff]  ;;  %v2915_v49 = vld [vmem:[%s3515_s2 + $0x10] sm:$0xff]  ;;  %v2921_v50 = vld [vmem:[#allocation2 + $0x20] sm:$0xff] }
  0x1c   :  { %2517 = vmatprep.mubr.msk.f32.mxu0 %vm317_vm0, %v2846_v13  ;;  %2527 = vmatprep.mubr.msk.f32.mxu1 %vm317_vm0, %v2846_v13  ;;  %v252_v21 = vcombine.low %v243_v3, %v250_v15  ;;  %v278_v22 = vrot.slane %v268_v12, %v2725_v8  ;;  %v285_v23 = vrot.slane %v269_v16, %v2725_v8  ;;  %v2905_v47 = vld [vmem:[#allocation2 + $0x28] sm:$0xff]  ;;  %v2929_v51 = vld [vmem:[%s3515_s2 + $0x38] sm:$0xff]  ;;  %v2333_v53 = vld [vmem:[%s3513_s0 + $0x20] sm:$0x1] }
  0x1d   :  { %v2857_v24 = vcombine.low %v210_v14, %v217_v17  ;;  %v259_v25 = vrot.slane %v251_v18, %v2725_v8  ;;  %v292_v26 = vrot.slane %v270_v19, %v2725_v8  ;;  %v299_v27 = vrot.slane %v271_v20, %v2725_v8  ;;  %v2934_v52 = vld [vmem:[%s3515_s2 + $0x18] sm:$0xff]  ;;  %v2334_v54 = vld [vmem:[%s3513_s0 + $0x21] sm:$0x1]  ;;  %v2335_v55 = vld [vmem:[%s3513_s0 + $0x22] sm:$0x1] }
  0x1e   :  { %v266_v28 = vrot.slane %v252_v21, %v2725_v8  ;;  %v300_v29 = vcombine.low %v278_v22, %v285_v23  ;;  %v2338_v56 = vld [vmem:[%s3513_s0 + $0x25] sm:$0x1]  ;;  %v1245_v57 = vcombine.low %v2333_v53, %v2334_v54  ;;  %v2339_v59 = vld [vmem:[%s3513_s0 + $0x26] sm:$0x1]  ;;  %v2340_v60 = vld [vmem:[%s3513_s0 + $0x27] sm:$0x1] }
  0x1f   :  { %2518 = vmatmul.mubr.msk.f32.vlgmr.msra.gmra.mxu0 %vm317_vm0, %v2857_v24  ;;  %2528 = vmatmul.mubr.msk.f32.vlgmr.msra.gmra.mxu1 %vm317_vm0, %v2857_v24  ;;  %v301_v30 = vcombine.low %v292_v26, %v299_v27  ;;  %v2978_v58 = vld [vmem:[%s3515_s2 + $0x40] sm:$0xff]  ;;  %v1248_v63 = vcombine.low %v2339_v59, %v2340_v60  ;;  %v2341_v1 = vld [vmem:[%s3513_s0 + $0x28] sm:$0x1]  ;;  %v2342_v2 = vld [vmem:[%s3513_s0 + $0x29] sm:$0x1] }
  0x20   :  { %v2867_v31 = vcombine.low %v259_v25, %v266_v28  ;;  %v308_v32 = vrot.slane %v300_v29, %v2725_v8  ;;  %v1255_v0 = vrot.slane %v1245_v57, %v2725_v8  ;;  %v2343_v10 = vld [vmem:[%s3513_s0 + $0x2a] sm:$0x1]  ;;  %v2344_v11 = vld [vmem:[%s3513_s0 + $0x2b] sm:$0x1]  ;;  %v2345_v12 = vld [vmem:[%s3513_s0 + $0x2c] sm:$0x1]  ;;  %v1294_v14 = vcombine.low %v2341_v1, %v2342_v2 }
  0x21   :  { %v315_v33 = vrot.slane %v301_v30, %v2725_v8  ;;  %v1276_v15 = vrot.slane %v1248_v63, %v2725_v8  ;;  %v2346_v16 = vld [vmem:[%s3513_s0 + $0x2d] sm:$0x1]  ;;  %v1295_v17 = vcombine.low %v2343_v10, %v2344_v11  ;;  %v2347_v19 = vld [vmem:[%s3513_s0 + $0x2e] sm:$0x1]  ;;  %v2348_v20 = vld [vmem:[%s3513_s0 + $0x2f] sm:$0x1] }
  0x22   :  { %2520 = vmatprep.mubr.msk.f32.mxu0 %vm317_vm0, %v2867_v31  ;;  %2530 = vmatprep.mubr.msk.f32.mxu1 %vm317_vm0, %v2867_v31  ;;  %v1296_v21 = vcombine.low %v2345_v12, %v2346_v16  ;;  %v1304_v22 = vrot.slane %v1294_v14, %v2725_v8  ;;  %v2349_v23 = vld [vmem:[%s3513_s0 + $0x30] sm:$0x1]  ;;  %v1297_v26 = vcombine.low %v2347_v19, %v2348_v20  ;;  %v2350_v28 = vld [vmem:[%s3513_s0 + $0x31] sm:$0x1]  ;;  %v2351_v29 = vld [vmem:[%s3513_s0 + $0x32] sm:$0x1] }
  0x23   :  { %v2875_v34 = vcombine.low %v308_v32, %v315_v33  ;;  %v1311_v27 = vrot.slane %v1295_v17, %v2725_v8  ;;  %v2352_v30 = vld [vmem:[%s3513_s0 + $0x33] sm:$0x1]  ;;  %v2356_v53 = vld [vmem:[%s3513_s0 + $0x37] sm:$0x1]  ;;  %v2359_v59 = vld [vmem:[%s3513_s0 + $0x3a] sm:$0x1] }
  0x24   :  { %v1318_v33 = vrot.slane %v1296_v21, %v2725_v8  ;;  %v2360_v60 = vld [vmem:[%s3513_s0 + $0x3b] sm:$0x1]  ;;  %v2364_v10 = vld [vmem:[%s3513_s0 + $0x3f] sm:$0x1] }
  0x25   :  { %2521 = vmatmul.mubr.msk.f32.gmra.mxu0 %vm317_vm0, %v2875_v34  ;;  %2531 = vmatmul.mubr.msk.f32.gmra.mxu1 %vm317_vm0, %v2875_v34  ;;  %v1393_v14 = vcombine.low %v2359_v59, %v2360_v60 }
  0x26   :  { %2541 = vmatprep.mubr.msk.f32.mxu0 %vm508_vm1, %v2884_v35  ;;  %2555 = vmatprep.mubr.msk.f32.mxu1 %vm508_vm1, %v2889_v36 }
  0x27   :  { %v1409_v21 = vrot.slane %v1393_v14, %v2725_v8 }
  0xdf   :  { %v2519_v37 = vpop.f32.mrf.mxu0  ;;  %v2529_v38 = vpop.f32.mrf.mxu1 }
  0xe1   :  { %v392_v39 = vpop.f32.mrf.mxu0  ;;  %v484_v40 = vpop.f32.mrf.mxu1 }
  0xe5   :  { %v2522_v41 = vpop.f32.mrf.mxu0  ;;  %v2532_v42 = vpop.f32.mrf.mxu1 }
  0xe6   :  { %2533 = vmatprep.subr.mxu0 %v2532_v42  ;;  %2547 = vmatprep.subr.mxu1 %v2522_v41 }
  0xe7   :  { %v402_v43 = vpop.f32.mrf.mxu0  ;;  %v494_v44 = vpop.f32.mrf.mxu1  ;;  %2534 = vmatpush3.msra.mxu0 %v2532_v42  ;;  %2548 = vmatpush3.msra.mxu1 %v2522_v41  ;;  %v1344_v41 = vcombine.low %v2351_v29, %v2352_v30  ;;  %v33_v29 = vld [vmem:[%s3516_s3 + $0x10] sm:$0xff] }
  0xe8   :  { %2535 = vmatprep.subr.mxu0 %v494_v44  ;;  %2549 = vmatprep.subr.mxu1 %v402_v43 }
  0xe9   :  { %2536 = vmatpush3.msra.mxu0 %v494_v44  ;;  %2550 = vmatpush3.msra.mxu1 %v402_v43  ;;  %v1325_v43 = vrot.slane %v1297_v26, %v2725_v8  ;;  %v1326_v44 = vcombine.low %v1304_v22, %v1311_v27  ;;  %v1360_v57 = vrot.slane %v1344_v41, %v2725_v8 }
  0xea   :  { %2537 = vmatprep.subr.mxu0 %v2529_v38  ;;  %2551 = vmatprep.subr.mxu1 %v2519_v37 }
  0xeb   :  { %2538 = vmatpush3.msra.mxu0 %v2529_v38  ;;  %2552 = vmatpush3.msra.mxu1 %v2519_v37  ;;  %v2353_v37 = vld [vmem:[%s3513_s0 + $0x34] sm:$0x1]  ;;  %v2354_v38 = vld [vmem:[%s3513_s0 + $0x35] sm:$0x1]  ;;  %v1334_v1 = vrot.slane %v1326_v44, %v2725_v8 }
  0xec   :  { %2539 = vmatprep.subr.mxu0 %v484_v40  ;;  %2553 = vmatprep.subr.mxu1 %v392_v39  ;;  %v1345_v54 = vcombine.low %v2353_v37, %v2354_v38 }
  0xed   :  { %2540 = vmatpush3.msra.mxu0 %v484_v40  ;;  %2554 = vmatpush3.msra.mxu1 %v392_v39  ;;  %v2355_v39 = vld [vmem:[%s3513_s0 + $0x36] sm:$0x1]  ;;  %v1343_v40 = vcombine.low %v2349_v23, %v2350_v28  ;;  %v31_v28 = vld [vmem:[%s3516_s3] sm:$0xff] }
  0xee   :  { %2542 = vmatmul.mubr.msk.f32.vlgmr.msra.gmra.mxu0 %vm508_vm1, %v2898_v45  ;;  %2556 = vmatmul.mubr.msk.f32.vlgmr.msra.gmra.mxu1 %vm508_vm1, %v2903_v46  ;;  %v1367_v2 = vrot.slane %v1345_v54, %v2725_v8 }
  0xef   :  { %2561 = vmatprep.subr.mxu0 %v2905_v47  ;;  %2544 = vmatprep.mubr.msk.f32.mxu0 %vm508_vm1, %v2910_v48 }
  0xf0   :  { %2562 = vmatpush3.msra.mxu0 %v2905_v47  ;;  %2558 = vmatprep.mubr.msk.f32.mxu1 %vm508_vm1, %v2915_v49 }
  0xf1   :  { %2563 = vmatprep.subr.mxu0 %v2921_v50 }
  0xf2   :  { %2545 = vmatmul.mubr.msk.f32.gmra.mxu0 %vm508_vm1, %v2929_v51  ;;  %2559 = vmatmul.mubr.msk.f32.gmra.mxu1 %vm508_vm1, %v2934_v52 }
  0xf3   :  { %2564 = vmatpush3.msra.mxu0 %v2921_v50  ;;  %2565 = vmatprep.mubr.msk.f32.mxu0 %vm317_vm0, %v2846_v13 }
  0xf4   :  { %2585 = vmatprep.subr.mxu0 %v2719_v5  ;;  %2579 = vmatprep.mubr.msk.f32.mxu1 %vm508_vm1, %v2978_v58 }
  0xf6   :  { %2566 = vmatmul.mubr.msk.f32.vlgmr.msra.gmra.mxu0 %vm317_vm0, %v2857_v24 }
  0xf7   :  { %2568 = vmatprep.mubr.msk.f32.mxu0 %vm317_vm0, %v2867_v31  ;;  %2586 = vmatpush3.msra.mxu0 %v2719_v5  ;;  %v2336_v5 = vld [vmem:[%s3513_s0 + $0x23] sm:$0x1] }
  0xf8   :  { %2587 = vmatprep.subr.mxu0 %v2723_v7  ;;  %v1246_v61 = vcombine.low %v2335_v55, %v2336_v5  ;;  %v2357_v55 = vld [vmem:[%s3513_s0 + $0x38] sm:$0x1]  ;;  %v2358_v5 = vld [vmem:[%s3513_s0 + $0x39] sm:$0x1] }
  0xf9   :  { %2588 = vmatpush3.msra.mxu0 %v2723_v7  ;;  %v2337_v7 = vld [vmem:[%s3513_s0 + $0x24] sm:$0x1] }
  0xfa   :  { %2569 = vmatmul.mubr.msk.f32.gmra.mxu0 %vm317_vm0, %v2875_v34  ;;  %v1247_v62 = vcombine.low %v2337_v7, %v2338_v56  ;;  %v1262_v3 = vrot.slane %v1246_v61, %v2725_v8  ;;  %v1346_v7 = vcombine.low %v2355_v39, %v2356_v53  ;;  %v1353_v56 = vrot.slane %v1343_v40, %v2725_v8  ;;  %v2361_v61 = vld [vmem:[%s3513_s0 + $0x3c] sm:$0x1]  ;;  %v32_v39 = vld [vmem:[%s3516_s3 + $0x8] sm:$0xff] }
  0xfb   :  { %v34_v40 = vld [vmem:[%s3516_s3 + $0x18] sm:$0xff] }
  0xfc   :  { %v1269_v4 = vrot.slane %v1247_v62, %v2725_v8  ;;  %v1277_v18 = vcombine.low %v1255_v0, %v1262_v3  ;;  %v1392_v62 = vcombine.low %v2357_v55, %v2358_v5  ;;  %v1327_v0 = vcombine.low %v1318_v33, %v1325_v43  ;;  %v2362_v3 = vld [vmem:[%s3513_s0 + $0x3d] sm:$0x1] }
  0xfd   :  { %v1374_v11 = vrot.slane %v1346_v7, %v2725_v8  ;;  %v1375_v12 = vcombine.low %v1353_v56, %v1360_v57  ;;  %v3117_v56 = vld [vmem:[%s3515_s2 + $0x48] sm:$0xff]  ;;  %v3133_v57 = vld [vmem:[%s3515_s2 + $0x58] sm:$0xff] }
  0xfe   :  { %v1278_v25 = vcombine.low %v1269_v4, %v1276_v15  ;;  %v1285_v32 = vrot.slane %v1277_v18, %v2725_v8  ;;  %v2363_v4 = vld [vmem:[%s3513_s0 + $0x3e] sm:$0x1]  ;;  %v1394_v15 = vcombine.low %v2361_v61, %v2362_v3  ;;  %v1341_v16 = vrot.slane %v1327_v0, %v2725_v8 }
  0xff   :  { %v1395_v17 = vcombine.low %v2363_v4, %v2364_v10  ;;  %v1402_v18 = vrot.slane %v1392_v62, %v2725_v8  ;;  %v1376_v19 = vcombine.low %v1367_v2, %v1374_v11  ;;  %v1383_v20 = vrot.slane %v1375_v12, %v2725_v8 }
 0x100   :  { %v1292_v42 = vrot.slane %v1278_v25, %v2725_v8  ;;  %v1416_v22 = vrot.slane %v1394_v15, %v2725_v8  ;;  %v3084_v23 = vcombine.low %v1334_v1, %v1341_v16 }
 0x101   :  { %v1423_v25 = vrot.slane %v1395_v17, %v2725_v8  ;;  %v1390_v26 = vrot.slane %v1376_v19, %v2725_v8  ;;  %v1424_v27 = vcombine.low %v1402_v18, %v1409_v21 }
 0x102   :  { %v3063_v63 = vcombine.low %v1285_v32, %v1292_v42  ;;  %v2690_v32 = vmov 0  }
 0x103   :  { %v1425_v30 = vcombine.low %v1416_v22, %v1423_v25  ;;  %2662 = vset.pattern.permute.xlu0 %v2690_v32  ;;  %v3096_v33 = vcombine.low %v1383_v20, %v1390_v26  ;;  %v1432_v37 = vrot.slane %v1424_v27, %v2725_v8  ;;  %2663 = vset.pattern.permute.xlu1 %v2690_v32 }
 0x104   :  { %2589 = vmatprep.mubr.msk.f32.mxu0 %vm317_vm0, %v3063_v63  ;;  %37 = vperm.xlu0 %2662, %v31_v28  }
 0x105   :  { %2590 = vmatmul.mubr.msk.f32.vlgmr.msra.gmra.mxu0 %vm317_vm0, %v3084_v23  ;;  %v1439_v38 = vrot.slane %v1425_v30, %v2725_v8  ;;  %47 = vperm.xlu1 %2663, %v33_v29  }
 0x106   :  { %2592 = vmatprep.mubr.msk.f32.mxu0 %vm317_vm0, %v3096_v33 }
 0x107   :  { %v3108_v41 = vcombine.low %v1432_v37, %v1439_v38 }
 0x108   :  { %42 = vperm.xlu0 %2662, %v32_v39  }
 0x109   :  { %2593 = vmatmul.mubr.msk.f32.gmra.mxu0 %vm317_vm0, %v3108_v41  ;;  %52 = vperm.xlu1 %2663, %v34_v40  }
 0x10a   :  { %2613 = vmatprep.mubr.msk.f32.mxu0 %vm508_vm1, %v2884_v35  ;;  %v3122_v35 = vld [vmem:[%s3515_s2 + $0x50] sm:$0xff] }
 0x17f   :  { %v3157_v0 = vpop.permute.xlu0 %37 }
 0x180   :  { %v3159_v2 = vpop.permute.xlu1 %47 }
 0x184   :  { %v3164_v15 = vpop.permute.xlu1 %52 }
 0x1ae   :  { %v2543_v42 = vpop.f32.mrf.mxu0 }
 0x1b0   :  { %v587_v43 = vpop.f32.mrf.mxu0 }
 0x1b2   :  { %v2546_v44 = vpop.f32.mrf.mxu0 }
 0x1b4   :  { %v597_v53 = vpop.f32.mrf.mxu0 }
 0x1b6   :  { %v2567_v54 = vpop.f32.mrf.mxu0 }
 0x1b8   :  { %v772_v55 = vpop.f32.mrf.mxu0 }
 0x1ba   :  { %v2570_v5 = vpop.f32.mrf.mxu0 }
 0x1bb   :  { %2571 = vmatprep.subr.mxu1 %v2570_v5 }
 0x1bc   :  { %v782_v7 = vpop.f32.mrf.mxu0  ;;  %2572 = vmatpush3.msra.mxu1 %v2570_v5 }
 0x1bd   :  { %2573 = vmatprep.subr.mxu1 %v782_v7 }
 0x1be   :  { %2574 = vmatpush3.msra.mxu1 %v782_v7 }
 0x1bf   :  { %2575 = vmatprep.subr.mxu1 %v2567_v54 }
 0x1c0   :  { %2576 = vmatpush3.msra.mxu1 %v2567_v54 }
 0x1c1   :  { %2577 = vmatprep.subr.mxu1 %v772_v55 }
 0x1c2   :  { %2578 = vmatpush3.msra.mxu1 %v772_v55 }
 0x1c3   :  { %2580 = vmatmul.mubr.msk.f32.vlgmr.msra.gmra.mxu1 %vm508_vm1, %v3117_v56  ;;  %2595 = vmatprep.subr.mxu1 %v2721_v6 }
 0x1c4   :  { %2596 = vmatpush3.msra.mxu1 %v2721_v6  ;;  %2582 = vmatprep.mubr.msk.f32.mxu1 %vm508_vm1, %v3122_v35 }
 0x1c5   :  { %2597 = vmatprep.subr.mxu1 %v2729_v9  ;;  %v2591_v6 = vpop.f32.mrf.mxu0 }
 0x1c6   :  { %2598 = vmatpush3.msra.mxu1 %v2729_v9 }
 0x1c7   :  { %2583 = vmatmul.mubr.msk.f32.gmra.mxu1 %vm508_vm1, %v3133_v57  ;;  %v1515_v9 = vpop.f32.mrf.mxu0 }
 0x1c8   :  { %2599 = vmatprep.mubr.msk.f32.mxu1 %vm317_vm0, %v3063_v63 }
 0x1c9   :  { %v2594_v59 = vpop.f32.mrf.mxu0 }
 0x1ca   :  { %2619 = vmatprep.subr.mxu1 %v2594_v59 }
 0x1cb   :  { %2600 = vmatmul.mubr.msk.f32.vlgmr.msra.gmra.mxu1 %vm317_vm0, %v3084_v23  ;;  %v1525_v60 = vpop.f32.mrf.mxu0 }
 0x1cc   :  { %2602 = vmatprep.mubr.msk.f32.mxu1 %vm317_vm0, %v3096_v33  ;;  %2620 = vmatpush3.msra.mxu1 %v2594_v59 }
 0x1cd   :  { %2621 = vmatprep.subr.mxu1 %v1525_v60 }
 0x1ce   :  { %2622 = vmatpush3.msra.mxu1 %v1525_v60 }
 0x1cf   :  { %2603 = vmatmul.mubr.msk.f32.gmra.mxu1 %vm317_vm0, %v3108_v41  ;;  %2623 = vmatprep.subr.mxu1 %v2591_v6 }
 0x1d0   :  { %2627 = vmatprep.mubr.msk.f32.mxu1 %vm508_vm1, %v2889_v36  ;;  %2624 = vmatpush3.msra.mxu1 %v2591_v6  ;;  %v2557_v36 = vpop.f32.mrf.mxu1 }
 0x1d1   :  { %2625 = vmatprep.subr.mxu1 %v1515_v9  ;;  %v690_v3 = vadd.f32 %v2557_v36, %v2543_v42 }
 0x1d2   :  { %2626 = vmatpush3.msra.mxu1 %v1515_v9  ;;  %v684_v61 = vpop.f32.mrf.mxu1 }
 0x1d3   :  { %2628 = vmatmul.mubr.msk.f32.vlgmr.msra.gmra.mxu1 %vm508_vm1, %v2903_v46  ;;  %v3161_v46 = vpop.permute.xlu0 %42  ;;  %v685_v10 = vadd.f32 %v684_v61, %v587_v43 }
 0x1d4   :  { %2630 = vmatprep.mubr.msk.f32.mxu1 %vm508_vm1, %v2915_v49  ;;  %v2560_v62 = vpop.f32.mrf.mxu1 }
 0x1d5   :  { %v700_v12 = vadd.f32 %v2560_v62, %v2546_v44 }
 0x1d6   :  { %v694_v1 = vpop.f32.mrf.mxu1 }
 0x1d7   :  { %2631 = vmatmul.mubr.msk.f32.gmra.mxu1 %vm508_vm1, %v2934_v52  ;;  %v695_v16 = vadd.f32 %v694_v1, %v597_v53 }
 0x1d8   :  { %2651 = vmatprep.mubr.msk.f32.mxu1 %vm508_vm1, %v2978_v58 }
 0x283   :  { %v2581_v4 = vpop.f32.mrf.mxu1 }
 0x284   :  { %v894_v49 = vadd.f32 %v2581_v4, %v690_v3 }
 0x285   :  { %v874_v11 = vpop.f32.mrf.mxu1 }
 0x286   :  { %v893_v52 = vadd.f32 %v874_v11, %v685_v10  ;;  %v898_v14 = vadd.f32 %v894_v49, %v3161_v46 }
 0x287   :  { %v2584_v58 = vpop.f32.mrf.mxu1 }
 0x288   :  { %v897_v17 = vadd.f32 %v893_v52, %v3157_v0  ;;  %v906_v18 = vadd.f32 %v898_v14, %v2857_v24  ;;  %v896_v19 = vadd.f32 %v2584_v58, %v700_v12 }
 0x289   :  { %v884_v20 = vpop.f32.mrf.mxu1 }
 0x28a   :  { %v905_v21 = vadd.f32 %v897_v17, %v2846_v13  ;;  %v910_v22 = vmax.f32 %v906_v18, 0.0  ;;  %v895_v25 = vadd.f32 %v884_v20, %v695_v16  ;;  %v900_v26 = vadd.f32 %v896_v19, %v3164_v15 }
 0x28b   :  { %v2601_v27 = vpop.f32.mrf.mxu1 }
 0x28c   :  { %v909_v28 = vmax.f32 %v905_v21, 0.0  ;;  %v966_v29 = vcombine.high %v910_v22, %v910_v22  ;;  %v973_v30 = vrot.slane %v910_v22, %v2725_v8  ;;  %v899_v32 = vadd.f32 %v895_v25, %v3159_v2 }
 0x28d   :  { %v908_v37 = vadd.f32 %v900_v26, %v2875_v34  ;;  %v3173_v38 = vpop.f32.mrf.mxu1 }
 0x28e   :  { %v917_v24 = vcombine.high %v909_v28, %v909_v28  ;;  %v924_v39 = vrot.slane %v909_v28, %v2725_v8  ;;  %v980_v13 = vrot.slane %v966_v29, %v2725_v8  ;;  %v981_v40 = vcombine.high %v973_v30, %v973_v30 }
 0x28f   :  { %v989_v42 = vrot.slane %v973_v30, %v2725_v8  ;;  %v907_v43 = vadd.f32 %v899_v32, %v2867_v31  ;;  %v912_v44 = vmax.f32 %v908_v37, 0.0  ;;  %v2604_v53 = vpop.f32.mrf.mxu1 }
 0x290   :  { %v931_v54 = vrot.slane %v917_v24, %v2725_v8  ;;  %v932_v55 = vcombine.high %v924_v39, %v924_v39  ;;  %v940_v5 = vrot.slane %v924_v39, %v2725_v8  ;;  %v982_v34 = vcombine.high %v980_v13, %v980_v13  ;;  %2605 = vmatprep.subr.mxu0 %v2604_v53 }
 0x291   :  { %v996_v7 = vrot.slane %v980_v13, %v2725_v8  ;;  %v1003_v6 = vrot.slane %v981_v40, %v2725_v8  ;;  %v1011_v9 = vcombine.high %v989_v42, %v989_v42  ;;  %1154 = vst.msk [vmem:[%s3517_s4 + $0x8] sm:$0x1] %vm1145_vm2, %v989_v42  ;;  %v911_v31 = vmax.f32 %v907_v43, 0.0  ;;  %v1616_v59 = vpop.f32.mrf.mxu1  ;;  %2606 = vmatpush3.msra.mxu0 %v2604_v53 }
 0x292   :  { %v933_v60 = vcombine.high %v931_v54, %v931_v54  ;;  %v947_v36 = vrot.slane %v931_v54, %v2725_v8  ;;  %v954_v61 = vrot.slane %v932_v55, %v2725_v8  ;;  %v962_v62 = vcombine.high %v940_v5, %v940_v5  ;;  %1146 = vst.msk [vmem:[%s3517_s4] sm:$0x1] %vm1145_vm2, %v940_v5 }
 0x293   :  { %2607 = vmatprep.subr.mxu0 %v1616_v59  ;;  %v1010_v1 = vrot.slane %v982_v34, %v2725_v8  ;;  %v1012_v3 = vcombine.high %v996_v7, %v996_v7  ;;  %v1013_v4 = vcombine.high %v1003_v6, %v1003_v6  ;;  %1155 = vst.msk [vmem:[%s3517_s4 + $0x9] sm:$0x1] %vm1145_vm2, %v1003_v6  ;;  %1156 = vst.msk [vmem:[%s3517_s4 + $0xa] sm:$0x1] %vm1145_vm2, %v1011_v9  ;;  %v2629_v34 = vpop.f32.mrf.mxu1 }
 0x294   :  { %1158 = vst.msk [vmem:[%s3517_s4 + $0xc] sm:$0x1] %vm1145_vm2, %v996_v7  ;;  %v1015_v10 = vcombine.high %v911_v31, %v911_v31  ;;  %2608 = vmatpush3.msra.mxu0 %v1616_v59  ;;  %v961_v49 = vrot.slane %v933_v60, %v2725_v8  ;;  %v963_v11 = vcombine.high %v947_v36, %v947_v36  ;;  %1147 = vst.msk [vmem:[%s3517_s4 + $0x1] sm:$0x1] %vm1145_vm2, %v954_v61 }
 0x295   :  { %v964_v12 = vcombine.high %v954_v61, %v954_v61  ;;  %1148 = vst.msk [vmem:[%s3517_s4 + $0x2] sm:$0x1] %vm1145_vm2, %v962_v62  ;;  %1150 = vst.msk [vmem:[%s3517_s4 + $0x4] sm:$0x1] %vm1145_vm2, %v947_v36  ;;  %v1022_v52 = vrot.slane %v911_v31, %v2725_v8  ;;  %2609 = vmatprep.subr.mxu0 %v2601_v27  ;;  %v1014_v14 = vcombine.high %v1010_v1, %v1010_v1  ;;  %v1804_v7 = vpop.f32.mrf.mxu1 }
 0x296   :  { %1157 = vst.msk [vmem:[%s3517_s4 + $0xb] sm:$0x1] %vm1145_vm2, %v1013_v4  ;;  %1159 = vst.msk [vmem:[%s3517_s4 + $0xd] sm:$0x1] %vm1145_vm2, %v1010_v1  ;;  %v1029_v58 = vrot.slane %v1015_v10, %v2725_v8  ;;  %v1064_v16 = vcombine.high %v912_v44, %v912_v44  ;;  %v1071_v17 = vrot.slane %v912_v44, %v2725_v8  ;;  %2610 = vmatpush3.msra.mxu0 %v2601_v27 }
 0x297   :  { %1160 = vst.msk [vmem:[%s3517_s4 + $0xe] sm:$0x1] %vm1145_vm2, %v1012_v3  ;;  %v965_v18 = vcombine.high %v961_v49, %v961_v49  ;;  %1149 = vst.msk [vmem:[%s3517_s4 + $0x3] sm:$0x1] %vm1145_vm2, %v964_v12  ;;  %v1030_v19 = vcombine.high %v1022_v52, %v1022_v52  ;;  %v1038_v20 = vrot.slane %v1022_v52, %v2725_v8  ;;  %2611 = vmatprep.subr.mxu0 %v3173_v38  ;;  %v2632_v6 = vpop.f32.mrf.mxu1 }
 0x298   :  { %1151 = vst.msk [vmem:[%s3517_s4 + $0x5] sm:$0x1] %vm1145_vm2, %v961_v49  ;;  %1152 = vst.msk [vmem:[%s3517_s4 + $0x6] sm:$0x1] %vm1145_vm2, %v963_v11  ;;  %v1031_v21 = vcombine.high %v1029_v58, %v1029_v58  ;;  %v1045_v22 = vrot.slane %v1029_v58, %v2725_v8  ;;  %v1078_v25 = vrot.slane %v1064_v16, %v2725_v8  ;;  %2612 = vmatpush3.msra.mxu0 %v3173_v38 }
 0x299   :  { %1161 = vst.msk [vmem:[%s3517_s4 + $0xf] sm:$0x1] %vm1145_vm2, %v1014_v14  ;;  %v1079_v26 = vcombine.high %v1071_v17, %v1071_v17  ;;  %1153 = vst.msk [vmem:[%s3517_s4 + $0x7] sm:$0x1] %vm1145_vm2, %v965_v18  ;;  %v1052_v27 = vrot.slane %v1030_v19, %v2725_v8  ;;  %v1060_v28 = vcombine.high %v1038_v20, %v1038_v20  ;;  %2614 = vmatmul.mubr.msk.f32.vlgmr.msra.gmra.mxu0 %vm508_vm1, %v2898_v45  ;;  %v1814_v9 = vpop.f32.mrf.mxu1 }
 0x29a   :  { %1162 = vst.msk [vmem:[%s3517_s4 + $0x10] sm:$0x1] %vm1145_vm2, %v1038_v20  ;;  %v1087_v29 = vrot.slane %v1071_v17, %v2725_v8  ;;  %2633 = vmatprep.subr.mxu0 %v2905_v47  ;;  %v1059_v30 = vrot.slane %v1031_v21, %v2725_v8  ;;  %v1061_v32 = vcombine.high %v1045_v22, %v1045_v22  ;;  %1166 = vst.msk [vmem:[%s3517_s4 + $0x14] sm:$0x1] %vm1145_vm2, %v1045_v22 }
 0x29b   :  { %v1080_v37 = vcombine.high %v1078_v25, %v1078_v25  ;;  %v1094_v38 = vrot.slane %v1078_v25, %v2725_v8  ;;  %2634 = vmatpush3.msra.mxu0 %v2905_v47  ;;  %v1062_v24 = vcombine.high %v1052_v27, %v1052_v27  ;;  %1163 = vst.msk [vmem:[%s3517_s4 + $0x11] sm:$0x1] %vm1145_vm2, %v1052_v27  ;;  %1164 = vst.msk [vmem:[%s3517_s4 + $0x12] sm:$0x1] %vm1145_vm2, %v1060_v28 }
 0x29c   :  { %v1101_v45 = vrot.slane %v1079_v26, %v2725_v8  ;;  %v1109_v39 = vcombine.high %v1087_v29, %v1087_v29  ;;  %1170 = vst.msk [vmem:[%s3517_s4 + $0x18] sm:$0x1] %vm1145_vm2, %v1087_v29  ;;  %2616 = vmatprep.mubr.msk.f32.mxu0 %vm508_vm1, %v2910_v48  ;;  %2635 = vmatprep.subr.mxu0 %v2921_v50  ;;  %1167 = vst.msk [vmem:[%s3517_s4 + $0x15] sm:$0x1] %vm1145_vm2, %v1059_v30 }
 0x29d   :  { %v1063_v47 = vcombine.high %v1059_v30, %v1059_v30  ;;  %1168 = vst.msk [vmem:[%s3517_s4 + $0x16] sm:$0x1] %vm1145_vm2, %v1061_v32  ;;  %v1108_v13 = vrot.slane %v1080_v37, %v2725_v8  ;;  %v1110_v40 = vcombine.high %v1094_v38, %v1094_v38  ;;  %1174 = vst.msk [vmem:[%s3517_s4 + $0x1c] sm:$0x1] %vm1145_vm2, %v1094_v38  ;;  %2636 = vmatpush3.msra.mxu0 %v2921_v50 }
 0x29e   :  { %1165 = vst.msk [vmem:[%s3517_s4 + $0x13] sm:$0x1] %vm1145_vm2, %v1062_v24  ;;  %v1111_v48 = vcombine.high %v1101_v45, %v1101_v45  ;;  %1171 = vst.msk [vmem:[%s3517_s4 + $0x19] sm:$0x1] %vm1145_vm2, %v1101_v45  ;;  %2617 = vmatmul.mubr.msk.f32.gmra.mxu0 %vm508_vm1, %v2929_v51 }
 0x29f   :  { %1172 = vst.msk [vmem:[%s3517_s4 + $0x1a] sm:$0x1] %vm1145_vm2, %v1109_v39  ;;  %1169 = vst.msk [vmem:[%s3517_s4 + $0x17] sm:$0x1] %vm1145_vm2, %v1063_v47  ;;  %v1112_v50 = vcombine.high %v1108_v13, %v1108_v13  ;;  %2637 = vmatprep.mubr.msk.f32.mxu0 %vm317_vm0, %v3063_v63 }
 0x2a0   :  { %1175 = vst.msk [vmem:[%s3517_s4 + $0x1d] sm:$0x1] %vm1145_vm2, %v1108_v13  ;;  %1176 = vst.msk [vmem:[%s3517_s4 + $0x1e] sm:$0x1] %vm1145_vm2, %v1110_v40 }
 0x2a1   :  { %1173 = vst.msk [vmem:[%s3517_s4 + $0x1b] sm:$0x1] %vm1145_vm2, %v1111_v48  ;;  %1177 = vst.msk [vmem:[%s3517_s4 + $0x1f] sm:$0x1] %vm1145_vm2, %v1112_v50 }
 0x2a2   :  { %2638 = vmatmul.mubr.msk.f32.vlgmr.msra.gmra.mxu0 %vm317_vm0, %v3084_v23 }
 0x2a3   :  { %2640 = vmatprep.mubr.msk.f32.mxu0 %vm317_vm0, %v3096_v33 }
 0x2a6   :  { %2641 = vmatmul.mubr.msk.f32.gmra.mxu0 %vm317_vm0, %v3108_v41 }
 0x359   :  { %v2615_v51 = vpop.f32.mrf.mxu0 }
 0x35a   :  { %v1810_v31 = vadd.f32 %v2629_v34, %v2615_v51 }
 0x35b   :  { %v1707_v42 = vpop.f32.mrf.mxu0 }
 0x35c   :  { %v1805_v60 = vadd.f32 %v1804_v7, %v1707_v42 }
 0x35e   :  { %v2618_v43 = vpop.f32.mrf.mxu0 }
 0x35f   :  { %v1820_v62 = vadd.f32 %v2632_v6, %v2618_v43 }
 0x360   :  { %v1717_v44 = vpop.f32.mrf.mxu0 }
 0x361   :  { %v1815_v4 = vadd.f32 %v1814_v9, %v1717_v44 }
 0x362   :  { %v2639_v53 = vpop.f32.mrf.mxu0 }
 0x364   :  { %v1891_v54 = vpop.f32.mrf.mxu0 }
 0x366   :  { %v2642_v55 = vpop.f32.mrf.mxu0 }
 0x367   :  { %2643 = vmatprep.subr.mxu1 %v2642_v55 }
 0x368   :  { %v1901_v5 = vpop.f32.mrf.mxu0  ;;  %2644 = vmatpush3.msra.mxu1 %v2642_v55 }
 0x369   :  { %2645 = vmatprep.subr.mxu1 %v1901_v5 }
 0x36a   :  { %2646 = vmatpush3.msra.mxu1 %v1901_v5 }
 0x36b   :  { %2647 = vmatprep.subr.mxu1 %v2639_v53 }
 0x36c   :  { %2648 = vmatpush3.msra.mxu1 %v2639_v53 }
 0x36d   :  { %2649 = vmatprep.subr.mxu1 %v1891_v54 }
 0x36e   :  { %2650 = vmatpush3.msra.mxu1 %v1891_v54 }
 0x36f   :  { %2652 = vmatmul.mubr.msk.f32.vlgmr.msra.gmra.mxu1 %vm508_vm1, %v3117_v56 }
 0x370   :  { %2654 = vmatprep.mubr.msk.f32.mxu1 %vm508_vm1, %v3122_v35 }
 0x373   :  { %2655 = vmatmul.mubr.msk.f32.gmra.mxu1 %vm508_vm1, %v3133_v57 }
 0x42f   :  { %v2653_v59 = vpop.f32.mrf.mxu1 }
 0x430   :  { %v2012_v36 = vadd.f32 %v2653_v59, %v1810_v31 }
 0x431   :  { %v1992_v61 = vpop.f32.mrf.mxu1 }
 0x432   :  { %v2016_v1 = vadd.f32 %v2012_v36, %v3161_v46  ;;  %v2011_v3 = vadd.f32 %v1992_v61, %v1805_v60 }
 0x433   :  { %v2656_v56 = vpop.f32.mrf.mxu1 }
 0x434   :  { %v2024_v35 = vadd.f32 %v2016_v1, %v3084_v23  ;;  %v2015_v10 = vadd.f32 %v2011_v3, %v3157_v0  ;;  %v2014_v57 = vadd.f32 %v2656_v56, %v1820_v62 }
 0x435   :  { %v2002_v49 = vpop.f32.mrf.mxu1 }
 0x436   :  { %v2028_v11 = vmax.f32 %v2024_v35, 0.0  ;;  %v2023_v12 = vadd.f32 %v2015_v10, %v3063_v63  ;;  %v2018_v52 = vadd.f32 %v2014_v57, %v3164_v15  ;;  %v2013_v14 = vadd.f32 %v2002_v49, %v1815_v4 }
 0x438   :  { %v2084_v58 = vcombine.high %v2028_v11, %v2028_v11  ;;  %v2091_v16 = vrot.slane %v2028_v11, %v2725_v8  ;;  %v2027_v17 = vmax.f32 %v2023_v12, 0.0  ;;  %v2026_v46 = vadd.f32 %v2018_v52, %v3108_v41 }
 0x439   :  { %v2017_v18 = vadd.f32 %v2013_v14, %v3159_v2 }
 0x43a   :  { %v2098_v23 = vrot.slane %v2084_v58, %v2725_v8  ;;  %v2099_v19 = vcombine.high %v2091_v16, %v2091_v16  ;;  %v2107_v0 = vrot.slane %v2091_v16, %v2725_v8  ;;  %v2035_v20 = vcombine.high %v2027_v17, %v2027_v17 }
 0x43b   :  { %v2042_v21 = vrot.slane %v2027_v17, %v2725_v8  ;;  %v2030_v63 = vmax.f32 %v2026_v46, 0.0  ;;  %v2025_v15 = vadd.f32 %v2017_v18, %v3096_v33 }
 0x43c   :  { %v2100_v22 = vcombine.high %v2098_v23, %v2098_v23  ;;  %v2114_v25 = vrot.slane %v2098_v23, %v2725_v8  ;;  %v2121_v26 = vrot.slane %v2099_v19, %v2725_v8  ;;  %v2129_v27 = vcombine.high %v2107_v0, %v2107_v0  ;;  %2405 = vst.msk [vmem:[%s3517_s4 + $0x28] sm:$0x1] %vm1145_vm2, %v2107_v0 }
 0x43d   :  { %v2049_v41 = vrot.slane %v2035_v20, %v2725_v8  ;;  %v2050_v2 = vcombine.high %v2042_v21, %v2042_v21  ;;  %v2058_v28 = vrot.slane %v2042_v21, %v2725_v8  ;;  %v2182_v29 = vcombine.high %v2030_v63, %v2030_v63 }
 0x43e   :  { %v2128_v30 = vrot.slane %v2100_v22, %v2725_v8  ;;  %v2130_v33 = vcombine.high %v2114_v25, %v2114_v25  ;;  %v2131_v32 = vcombine.high %v2121_v26, %v2121_v26  ;;  %2406 = vst.msk [vmem:[%s3517_s4 + $0x29] sm:$0x1] %vm1145_vm2, %v2121_v26  ;;  %2407 = vst.msk [vmem:[%s3517_s4 + $0x2a] sm:$0x1] %vm1145_vm2, %v2129_v27  ;;  %v2029_v43 = vmax.f32 %v2025_v15, 0.0 }
 0x43f   :  { %2409 = vst.msk [vmem:[%s3517_s4 + $0x2c] sm:$0x1] %vm1145_vm2, %v2114_v25  ;;  %v2189_v37 = vrot.slane %v2030_v63, %v2725_v8  ;;  %v2051_v38 = vcombine.high %v2049_v41, %v2049_v41  ;;  %v2065_v24 = vrot.slane %v2049_v41, %v2725_v8  ;;  %v2072_v45 = vrot.slane %v2050_v2, %v2725_v8 }
 0x440   :  { %v2080_v39 = vcombine.high %v2058_v28, %v2058_v28  ;;  %2397 = vst.msk [vmem:[%s3517_s4 + $0x20] sm:$0x1] %vm1145_vm2, %v2058_v28  ;;  %v2132_v47 = vcombine.high %v2128_v30, %v2128_v30  ;;  %2408 = vst.msk [vmem:[%s3517_s4 + $0x2b] sm:$0x1] %vm1145_vm2, %v2131_v32  ;;  %v2196_v13 = vrot.slane %v2182_v29, %v2725_v8 }
 0x441   :  { %2410 = vst.msk [vmem:[%s3517_s4 + $0x2d] sm:$0x1] %vm1145_vm2, %v2128_v30  ;;  %2411 = vst.msk [vmem:[%s3517_s4 + $0x2e] sm:$0x1] %vm1145_vm2, %v2130_v33  ;;  %v2197_v40 = vcombine.high %v2189_v37, %v2189_v37  ;;  %v2205_v48 = vrot.slane %v2189_v37, %v2725_v8  ;;  %v2079_v50 = vrot.slane %v2051_v38, %v2725_v8 }
 0x442   :  { %v2081_v51 = vcombine.high %v2065_v24, %v2065_v24  ;;  %v2082_v42 = vcombine.high %v2072_v45, %v2072_v45  ;;  %2398 = vst.msk [vmem:[%s3517_s4 + $0x21] sm:$0x1] %vm1145_vm2, %v2072_v45  ;;  %2399 = vst.msk [vmem:[%s3517_s4 + $0x22] sm:$0x1] %vm1145_vm2, %v2080_v39  ;;  %v2198_v44 = vcombine.high %v2196_v13, %v2196_v13 }
 0x443   :  { %2401 = vst.msk [vmem:[%s3517_s4 + $0x24] sm:$0x1] %vm1145_vm2, %v2065_v24  ;;  %2412 = vst.msk [vmem:[%s3517_s4 + $0x2f] sm:$0x1] %vm1145_vm2, %v2132_v47  ;;  %v2212_v53 = vrot.slane %v2196_v13, %v2725_v8  ;;  %v2219_v54 = vrot.slane %v2197_v40, %v2725_v8  ;;  %v2227_v55 = vcombine.high %v2205_v48, %v2205_v48 }
 0x444   :  { %2421 = vst.msk [vmem:[%s3517_s4 + $0x38] sm:$0x1] %vm1145_vm2, %v2205_v48  ;;  %v2083_v5 = vcombine.high %v2079_v50, %v2079_v50  ;;  %2400 = vst.msk [vmem:[%s3517_s4 + $0x23] sm:$0x1] %vm1145_vm2, %v2082_v42  ;;  %v2133_v34 = vcombine.high %v2029_v43, %v2029_v43  ;;  %v2140_v7 = vrot.slane %v2029_v43, %v2725_v8 }
 0x445   :  { %2402 = vst.msk [vmem:[%s3517_s4 + $0x25] sm:$0x1] %vm1145_vm2, %v2079_v50  ;;  %2403 = vst.msk [vmem:[%s3517_s4 + $0x26] sm:$0x1] %vm1145_vm2, %v2081_v51  ;;  %v2226_v6 = vrot.slane %v2198_v44, %v2725_v8  ;;  %v2228_v9 = vcombine.high %v2212_v53, %v2212_v53  ;;  %v2229_v31 = vcombine.high %v2219_v54, %v2219_v54 }
 0x446   :  { %2422 = vst.msk [vmem:[%s3517_s4 + $0x39] sm:$0x1] %vm1145_vm2, %v2219_v54  ;;  %2423 = vst.msk [vmem:[%s3517_s4 + $0x3a] sm:$0x1] %vm1145_vm2, %v2227_v55  ;;  %v2147_v59 = vrot.slane %v2133_v34, %v2725_v8  ;;  %v2148_v60 = vcombine.high %v2140_v7, %v2140_v7  ;;  %v2156_v36 = vrot.slane %v2140_v7, %v2725_v8 }
 0x447   :  { %2425 = vst.msk [vmem:[%s3517_s4 + $0x3c] sm:$0x1] %vm1145_vm2, %v2212_v53  ;;  %2404 = vst.msk [vmem:[%s3517_s4 + $0x27] sm:$0x1] %vm1145_vm2, %v2083_v5  ;;  %v2230_v61 = vcombine.high %v2226_v6, %v2226_v6 }
 0x448   :  { %2424 = vst.msk [vmem:[%s3517_s4 + $0x3b] sm:$0x1] %vm1145_vm2, %v2229_v31  ;;  %2426 = vst.msk [vmem:[%s3517_s4 + $0x3d] sm:$0x1] %vm1145_vm2, %v2226_v6  ;;  %v2149_v62 = vcombine.high %v2147_v59, %v2147_v59  ;;  %v2163_v1 = vrot.slane %v2147_v59, %v2725_v8  ;;  %v2170_v3 = vrot.slane %v2148_v60, %v2725_v8 }
 0x449   :  { %2427 = vst.msk [vmem:[%s3517_s4 + $0x3e] sm:$0x1] %vm1145_vm2, %v2228_v9  ;;  %v2178_v56 = vcombine.high %v2156_v36, %v2156_v36  ;;  %2413 = vst.msk [vmem:[%s3517_s4 + $0x30] sm:$0x1] %vm1145_vm2, %v2156_v36 }
 0x44a   :  { %2428 = vst.msk [vmem:[%s3517_s4 + $0x3f] sm:$0x1] %vm1145_vm2, %v2230_v61  ;;  %v2177_v4 = vrot.slane %v2149_v62, %v2725_v8  ;;  %v2179_v35 = vcombine.high %v2163_v1, %v2163_v1  ;;  %v2180_v10 = vcombine.high %v2170_v3, %v2170_v3  ;;  %2414 = vst.msk [vmem:[%s3517_s4 + $0x31] sm:$0x1] %vm1145_vm2, %v2170_v3 }
 0x44b   :  { %2415 = vst.msk [vmem:[%s3517_s4 + $0x32] sm:$0x1] %vm1145_vm2, %v2178_v56  ;;  %2417 = vst.msk [vmem:[%s3517_s4 + $0x34] sm:$0x1] %vm1145_vm2, %v2163_v1 }
 0x44c   :  { %v2181_v57 = vcombine.high %v2177_v4, %v2177_v4  ;;  %2416 = vst.msk [vmem:[%s3517_s4 + $0x33] sm:$0x1] %vm1145_vm2, %v2180_v10  ;;  %2418 = vst.msk [vmem:[%s3517_s4 + $0x35] sm:$0x1] %vm1145_vm2, %v2177_v4 }
 0x44d   :  { %2419 = vst.msk [vmem:[%s3517_s4 + $0x36] sm:$0x1] %vm1145_vm2, %v2179_v35 }
 0x44e   :  { %2420 = vst.msk [vmem:[%s3517_s4 + $0x37] sm:$0x1] %vm1145_vm2, %v2181_v57 }
 0x44f   :  { %2300 = vsyncpa [#allocation3], 1 }

</bundles_post_ra>
